<compile_context>
chip_gen: v7x
topology: tpu7x:2x2x1
jax: 0.10.0
libtpu: 0.0.40
codegen_flags: <defaults>
</compile_context>

<pallas_src>
import jax
import jax.numpy as jnp
from jax.experimental import pallas as pl
from jax.experimental.pallas import tpu as pltpu

PPO_NETWORK_INPUT_SIZE = 32
PREDICTION_NETWORK_OUTPUT_SIZE = 64
PPO_NETWORK_OUTPUT_SIZE = 8
USE_PREDICTION = True          # False branch would simply drop the belief matmul term

OBS_ENC_SIZE = 64
HIDDEN_SIZE = 64
FUSION_SIZE = OBS_ENC_SIZE + PREDICTION_NETWORK_OUTPUT_SIZE
LANE = 128                     # lane-dense width for all padded weight tensors

# Row offsets inside the packed parameter slab (one (PARAM_ROWS, 128) f32 array).
_R_WO = 0                                               # obs_proj.T      (32, 128)
_R_W1O = _R_WO + PPO_NETWORK_INPUT_SIZE                 # fc1[:, :64].T   (128, 128)
_R_W1B = _R_W1O + LANE                                  # fc1[:, 64:].T   (64, 128)
_R_W2 = _R_W1B + PREDICTION_NETWORK_OUTPUT_SIZE         # fc2.T           (128, 128)
_R_BIAS = _R_W2 + LANE                                  # biases          (8, 128)
PARAM_ROWS = _R_BIAS + 8                                # 360 (multiple of 8)

GRID_MIN_BATCH = 256           # below this, single no-grid VMEM-resident call


def actor_kernel(obs_ref, belief_ref, p_ref, o_ref):
    # Activations arrive as bf16 (halved HBM traffic); compute/accumulate in f32.
    obs = obs_ref[...].astype(jnp.float32)        # (TB, PPO_IN)
    belief = belief_ref[...].astype(jnp.float32)  # (TB, PRED_OUT)

    # Static, sublane-aligned slices of the packed parameter slab (zero-cost views).
    wo = p_ref[_R_WO:_R_W1O, :]                   # (32, 128)
    w1o = p_ref[_R_W1O:_R_W1B, :]                 # (128, 128)
    w1b = p_ref[_R_W1B:_R_W2, :]                  # (64, 128)
    w2 = p_ref[_R_W2:_R_BIAS, :]                  # (128, 128), cols PPO_OUT.. are 0
    b_all = p_ref[_R_BIAS:PARAM_ROWS, :]          # (8, 128): rows 0/1/2 = bo/b1/b2
    bo = b_all[0:1, :]
    b1 = b_all[1:2, :]
    b2 = b_all[2:3, :]

    # Observation encoder: relu(obs @ Wo + bo) -> (TB, 128); padded cols are 0.
    enc = jnp.dot(obs, wo, preferred_element_type=jnp.float32)
    enc = jnp.maximum(enc + bo, 0.0)

    # fc1 over cat([enc_obs, belief]) realized as a split matmul (no lane concat).
    h = jnp.dot(enc, w1o, preferred_element_type=jnp.float32)
    h = h + jnp.dot(belief, w1b, preferred_element_type=jnp.float32)
    h = jnp.maximum(h + b1, 0.0)

    # TODO(synk): nn.Dropout(0.3) training-mode masking not implemented
    # (eval-mode forward => identity; would use pltpu.prng_seed + stateful_bernoulli).

    # fc2 (no activation); store only the logical output width (masked vst is
    # negligible vs. the HBM traffic saved by not writing a 128-wide slab).
    out = jnp.dot(h, w2, preferred_element_type=jnp.float32) + b2
    o_ref[...] = out[:, :PPO_NETWORK_OUTPUT_SIZE].astype(o_ref.dtype)


def _pad_cols(x, n):
    return jnp.pad(x, ((0, 0), (0, n - x.shape[1])))


def _pad_rows(x, n):
    return jnp.pad(x, ((0, n - x.shape[0]), (0, 0)))


def prepare_params(params):
    """One-time parameter prep (hoisted out of the per-call path):
    transpose PyTorch (out, in) weights to (in, out), split fc1 across the concat,
    zero-pad every lane dimension to 128, and pack everything (weights + biases)
    into a single lane-dense (PARAM_ROWS, 128) f32 slab -> one input stream."""
    wo, bo = params["obs_proj"]   # (64, PPO_IN), (64,)
    w1, b1 = params["fc1"]        # (H, FUSION), (H,)
    w2, b2 = params["fc2"]        # (PPO_OUT, H), (PPO_OUT,)

    wo_p = _pad_cols(wo.T.astype(jnp.float32), LANE)                       # (32, 128)
    w1o_p = _pad_cols(_pad_rows(w1[:, :OBS_ENC_SIZE].T, LANE), LANE)       # (128, 128)
    w1b_p = _pad_cols(w1[:, OBS_ENC_SIZE:].T, LANE)                        # (64, 128)
    w2_p = _pad_cols(_pad_rows(w2.T, LANE), LANE)                          # (128, 128)

    biases = jnp.zeros((8, LANE), jnp.float32)
    biases = biases.at[0, :OBS_ENC_SIZE].set(bo)
    biases = biases.at[1, :HIDDEN_SIZE].set(b1)
    biases = biases.at[2, :PPO_NETWORK_OUTPUT_SIZE].set(b2)

    packed = jnp.concatenate(
        [wo_p, w1o_p, w1b_p, w2_p, biases], axis=0).astype(jnp.float32)
    assert packed.shape == (PARAM_ROWS, LANE)
    return packed


def _cost_estimate(batch):
    flops = 2 * batch * (PPO_NETWORK_INPUT_SIZE * OBS_ENC_SIZE
                         + FUSION_SIZE * HIDDEN_SIZE
                         + HIDDEN_SIZE * PPO_NETWORK_OUTPUT_SIZE)
    bytes_accessed = (batch * (PPO_NETWORK_INPUT_SIZE + PREDICTION_NETWORK_OUTPUT_SIZE) * 2  # bf16 in
                      + PARAM_ROWS * LANE * 4                                               # params
                      + batch * PPO_NETWORK_OUTPUT_SIZE * 4)                                # f32 out
    return pl.CostEstimate(flops=flops, transcendentals=0,
                           bytes_accessed=bytes_accessed)


def actor_forward(obs, encoded_belief, params_packed, *, batch_tile=1024):
    """obs: (B, PPO_IN); encoded_belief: (B, PRED_OUT); params_packed: prepare_params(...)."""
    B = obs.shape[0]
    # bf16 activations at the boundary halve input HBM traffic; accumulation stays f32.
    obs = obs.astype(jnp.bfloat16)
    belief = encoded_belief.astype(jnp.bfloat16)

    if B >= GRID_MIN_BATCH:
        # Batched path: tile only the batch dim, weights resident, batch "parallel".
        tb = batch_tile
        # Keep the grid length >= 2 so the "parallel" axis can shard across both
        # v7x TensorCores (no-op on v5e/v6e); tb stays a multiple of 16 (bf16 sublanes).
        while tb > 128 and pl.cdiv(B, tb) < 2:
            tb //= 2
        Bp = pl.cdiv(B, tb) * tb
        if Bp != B:   # pad rows up to a tile multiple instead of dropping to no-grid
            obs = jnp.pad(obs, ((0, Bp - B), (0, 0)))
            belief = jnp.pad(belief, ((0, Bp - B), (0, 0)))

        out = pl.pallas_call(
            actor_kernel,
            out_shape=jax.ShapeDtypeStruct((Bp, PPO_NETWORK_OUTPUT_SIZE), jnp.float32),
            grid=(Bp // tb,),
            in_specs=[
                pl.BlockSpec((tb, PPO_NETWORK_INPUT_SIZE), lambda i: (i, 0)),
                pl.BlockSpec((tb, PREDICTION_NETWORK_OUTPUT_SIZE), lambda i: (i, 0)),
                pl.BlockSpec((PARAM_ROWS, LANE), lambda i: (0, 0)),
            ],
            out_specs=pl.BlockSpec((tb, PPO_NETWORK_OUTPUT_SIZE), lambda i: (i, 0)),
            compiler_params=pltpu.CompilerParams(
                dimension_semantics=("parallel",)),
            cost_estimate=_cost_estimate(Bp),
        )(obs, belief, params_packed)
        return out[:B] if Bp != B else out

    # Tiny-batch path: no grid, no pipeline machinery — everything VMEM resident.
    # (At B ~ 8 this is pure fixed overhead either way; kept for completeness.)
    vmem = pl.BlockSpec(memory_space=pltpu.MemorySpace.VMEM)
    return pl.pallas_call(
        actor_kernel,
        out_shape=jax.ShapeDtypeStruct((B, PPO_NETWORK_OUTPUT_SIZE), jnp.float32),
        in_specs=[vmem, vmem, vmem],
        out_specs=vmem,
        cost_estimate=_cost_estimate(B),
    )(obs, belief, params_packed)


if __name__ == "__main__":
    key = jax.random.PRNGKey(0)
    keys = jax.random.split(key, 8)

    def linear_init(kw, kb, out_dim, in_dim):
        # mimics nn.Linear's uniform(-1/sqrt(in), 1/sqrt(in))
        bound = 1.0 / jnp.sqrt(jnp.float32(in_dim))
        w = jax.random.uniform(kw, (out_dim, in_dim), jnp.float32, -bound, bound)
        b = jax.random.uniform(kb, (out_dim,), jnp.float32, -bound, bound)
        return w, b

    params = {
        "obs_proj": linear_init(keys[0], keys[1], OBS_ENC_SIZE, PPO_NETWORK_INPUT_SIZE),
        "fc1": linear_init(keys[2], keys[3], HIDDEN_SIZE, FUSION_SIZE),
        "fc2": linear_init(keys[4], keys[5], PPO_NETWORK_OUTPUT_SIZE, HIDDEN_SIZE),
    }
    params_packed = prepare_params(params)   # done ONCE, outside the per-call path

    def reference(obs, belief):
        # Reference uses the same bf16-rounded activations the kernel sees, f32 math.
        obs = obs.astype(jnp.bfloat16).astype(jnp.float32)
        belief = belief.astype(jnp.bfloat16).astype(jnp.float32)
        wo, bo = params["obs_proj"]
        w1, b1 = params["fc1"]
        w2, b2 = params["fc2"]
        with jax.default_matmul_precision("highest"):
            enc = jnp.maximum(obs @ wo.T + bo, 0.0)
            fused = jnp.concatenate([enc, belief], axis=-1)
            h = jnp.maximum(fused @ w1.T + b1, 0.0)
            return h @ w2.T + b2            # dropout is identity in eval mode

    # --- small batch: no-grid VMEM-resident path ---
    B = 8
    obs = jax.random.normal(keys[6], (B, PPO_NETWORK_INPUT_SIZE), jnp.float32)
    belief = jax.random.normal(keys[7], (B, PREDICTION_NETWORK_OUTPUT_SIZE), jnp.float32)
    out = jax.block_until_ready(actor_forward(obs, belief, params_packed))
    assert out.shape == (B, PPO_NETWORK_OUTPUT_SIZE)
    assert jnp.allclose(out, reference(obs, belief), atol=5e-3, rtol=5e-3)

    # --- larger, non-multiple batch: row-padded, batch-tiled "parallel" grid path ---
    BB = 2000   # pads to 2048 -> grid of 2 steps (even, v7x megacore-friendly)
    obs_b = jax.random.normal(keys[6], (BB, PPO_NETWORK_INPUT_SIZE), jnp.float32)
    belief_b = jax.random.normal(keys[7], (BB, PREDICTION_NETWORK_OUTPUT_SIZE), jnp.float32)
    out_b = jax.block_until_ready(actor_forward(obs_b, belief_b, params_packed))
    assert out_b.shape == (BB, PPO_NETWORK_OUTPUT_SIZE)
    assert jnp.allclose(out_b, reference(obs_b, belief_b), atol=5e-3, rtol=5e-3)

    print("KERNEL_OK")
</pallas_src>

<mosaic_0001>
module attributes {stable_mosaic.version = 11 : i64} {
  func.func @actor_kernel(%arg0: memref<8x32xbf16, #tpu.memory_space<vmem>>, %arg1: memref<8x64xbf16, #tpu.memory_space<vmem>>, %arg2: memref<360x128xf32, #tpu.memory_space<vmem>>, %arg3: memref<8x8xf32, #tpu.memory_space<vmem>>) attributes {dimension_semantics = [], scalar_prefetch = 0 : i64, scratch_operands = 0 : i64, tpu.core_type = #tpu.core_type<tc>} {
    %c0 = arith.constant 0 : index
    %c0_0 = arith.constant 0 : index
    %0 = vector.load %arg0[%c0, %c0_0] : memref<8x32xbf16, #tpu.memory_space<vmem>>, vector<8x32xbf16>
    %1 = arith.extf %0 : vector<8x32xbf16> to vector<8x32xf32>
    %c0_1 = arith.constant 0 : index
    %c0_2 = arith.constant 0 : index
    %2 = vector.load %arg1[%c0_1, %c0_2] : memref<8x64xbf16, #tpu.memory_space<vmem>>, vector<8x64xbf16>
    %3 = arith.extf %2 : vector<8x64xbf16> to vector<8x64xf32>
    %c0_3 = arith.constant 0 : index
    %c0_4 = arith.constant 0 : index
    %4 = vector.load %arg2[%c0_3, %c0_4] : memref<360x128xf32, #tpu.memory_space<vmem>>, vector<32x128xf32>
    %c32 = arith.constant 32 : index
    %c0_5 = arith.constant 0 : index
    %5 = vector.load %arg2[%c32, %c0_5] : memref<360x128xf32, #tpu.memory_space<vmem>>, vector<128x128xf32>
    %c160 = arith.constant 160 : index
    %c0_6 = arith.constant 0 : index
    %6 = vector.load %arg2[%c160, %c0_6] : memref<360x128xf32, #tpu.memory_space<vmem>>, vector<64x128xf32>
    %c224 = arith.constant 224 : index
    %c0_7 = arith.constant 0 : index
    %7 = vector.load %arg2[%c224, %c0_7] : memref<360x128xf32, #tpu.memory_space<vmem>>, vector<128x128xf32>
    %c352 = arith.constant 352 : index
    %c0_8 = arith.constant 0 : index
    %8 = vector.load %arg2[%c352, %c0_8] : memref<360x128xf32, #tpu.memory_space<vmem>>, vector<8x128xf32>
    %9 = vector.extract_strided_slice %8 {offsets = [0, 0], sizes = [1, 128], strides = [1, 1]} : vector<8x128xf32> to vector<1x128xf32>
    %10 = vector.extract_strided_slice %8 {offsets = [1, 0], sizes = [1, 128], strides = [1, 1]} : vector<8x128xf32> to vector<1x128xf32>
    %11 = vector.extract_strided_slice %8 {offsets = [2, 0], sizes = [1, 128], strides = [1, 1]} : vector<8x128xf32> to vector<1x128xf32>
    %cst = arith.constant dense<0.000000e+00> : vector<8x128xf32>
    %12 = tpu.matmul %1, %4, %cst {dimension_numbers = #tpu.dot_dimension_numbers<[1], [0], [0], [1], [0, 0, 1, 1], [], []>} : vector<8x32xf32>, vector<32x128xf32>, vector<8x128xf32> -> vector<8x128xf32>
    %13 = vector.broadcast %9 : vector<1x128xf32> to vector<8x128xf32>
    %14 = arith.addf %12, %13 : vector<8x128xf32>
    %cst_9 = arith.constant 0.000000e+00 : f32
    %15 = vector.broadcast %cst_9 : f32 to vector<8x128xf32>
    %16 = arith.maximumf %14, %15 : vector<8x128xf32>
    %cst_10 = arith.constant dense<0.000000e+00> : vector<8x128xf32>
    %17 = tpu.matmul %16, %5, %cst_10 {dimension_numbers = #tpu.dot_dimension_numbers<[1], [0], [0], [1], [0, 0, 1, 1], [], []>} : vector<8x128xf32>, vector<128x128xf32>, vector<8x128xf32> -> vector<8x128xf32>
    %cst_11 = arith.constant dense<0.000000e+00> : vector<8x128xf32>
    %18 = tpu.matmul %3, %6, %cst_11 {dimension_numbers = #tpu.dot_dimension_numbers<[1], [0], [0], [1], [0, 0, 1, 1], [], []>} : vector<8x64xf32>, vector<64x128xf32>, vector<8x128xf32> -> vector<8x128xf32>
    %19 = arith.addf %17, %18 : vector<8x128xf32>
    %20 = vector.broadcast %10 : vector<1x128xf32> to vector<8x128xf32>
    %21 = arith.addf %19, %20 : vector<8x128xf32>
    %cst_12 = arith.constant 0.000000e+00 : f32
    %22 = vector.broadcast %cst_12 : f32 to vector<8x128xf32>
    %23 = arith.maximumf %21, %22 : vector<8x128xf32>
    %cst_13 = arith.constant dense<0.000000e+00> : vector<8x128xf32>
    %24 = tpu.matmul %23, %7, %cst_13 {dimension_numbers = #tpu.dot_dimension_numbers<[1], [0], [0], [1], [0, 0, 1, 1], [], []>} : vector<8x128xf32>, vector<128x128xf32>, vector<8x128xf32> -> vector<8x128xf32>
    %25 = vector.broadcast %11 : vector<1x128xf32> to vector<8x128xf32>
    %26 = arith.addf %24, %25 : vector<8x128xf32>
    %27 = vector.extract_strided_slice %26 {offsets = [0, 0], sizes = [8, 8], strides = [1, 1]} : vector<8x128xf32> to vector<8x8xf32>
    %c0_14 = arith.constant 0 : index
    %c0_15 = arith.constant 0 : index
    %28 = vector.load %arg3[%c0_14, %c0_15] : memref<8x8xf32, #tpu.memory_space<vmem>>, vector<8x8xf32>
    tpu.vector_store %arg3[%c0_14, %c0_15], %27 {strides = array<i32>} : memref<8x8xf32, #tpu.memory_space<vmem>>, vector<8x8xf32>,
    return
  }
}

</mosaic_0001>

<bundles_post_ra>
// kernel: tpu_custom_call.1
= control target key start
LH: loop header
LB: loop body
LE: loop exit
PB: predicated region body
PF: predicated region fallthrough
CT: control target
= control target key end

     0   :  { %8 = vsyncpa [#allocation3], 0  ;;  %s848_s0 = inlined_call_operand.hbm [shape: bf16[8,32], index: 0, kind: input, shape index: {}]   ;;  %s849_s1 = inlined_call_operand.hbm [shape: bf16[8,64], index: 1, kind: input, shape index: {}]   ;;  %s850_s2 = inlined_call_operand.hbm [shape: f32[360,128], index: 2, kind: input, shape index: {}]   ;;  %s851_s3 = inlined_call_operand.hbm [shape: f32[8,8], index: 3, kind: output, shape index: {}]  }
   0x1   :  { %9 = vsyncpa [#allocation6], 0 }
   0x2   :  { %10 = vsyncpa [#allocation4], 0  ;;  %s741_s12 = smov [#allocation5]   ;;  %s742_s14 = smov [#allocation2]  }
   0x3   :  { %s27_s13 = sshll.u32 %s741_s12, 4  ;;  %s17_s15 = sshll.u32 %s742_s14, 4  ;;  %s28_s13 = int_to_ptr.vmem [resolvable:$true] %s27_s13  ;;  %s18_s15 = int_to_ptr.vmem [resolvable:$true] %s17_s15 }
   0x4   :  { %s647_s18 = scalar_lea.hbm %s849_s1, 64 }
   0x5   :  { %p648_p0 = scmp.ne.s32.totalorder %s849_s1, %s647_s18  ;;  %p651_p1 = scmp.lt.u32.totalorder %s647_s18, %s849_s1 }
   0x7   :  { %p653_p2 = pnand %p651_p1, %p648_p0 }
   0x9   :  { %656 = shalt.err (!%p653_p2)
}
   0xa   :  { %s657_s23 = scalar_lea.vmem %s28_s13, 64  ;;  %p662_p4 = scmp.lt.s32.totalorder %s28_s13, %s28_s13 }
   0xb   :  { %p658_p3 = scmp.ne.s32.totalorder %s28_s13, %s657_s23  ;;  %p663_p5 = scmp.lt.s32.totalorder %s657_s23, %s657_s23 }
   0xd   :  { %p664_p6 = por %p663_p5, %p662_p4 }
   0xf   :  { %p665_p7 = pnand %p664_p6, %p658_p3 }
  0x11   :  { %668 = shalt.err (!%p665_p7)
}
  0x12   :  { %30 = dma.hbm_to_vmem [thread:$0]  %s849_s1, 64, %s28_s13, [#allocation6]  }
  0x13   :  { %s669_s28 = scalar_lea.hbm %s848_s0, 64 }
  0x14   :  { %p670_p8 = scmp.ne.s32.totalorder %s848_s0, %s669_s28  ;;  %p673_p9 = scmp.lt.u32.totalorder %s669_s28, %s848_s0 }
  0x16   :  { %p675_p10 = pnand %p673_p9, %p670_p8 }
  0x18   :  { %678 = shalt.err (!%p675_p10)
}
  0x19   :  { %s679_s6 = scalar_lea.vmem %s18_s15, 64  ;;  %p684_p12 = scmp.lt.s32.totalorder %s18_s15, %s18_s15 }
  0x1a   :  { %p680_p11 = scmp.ne.s32.totalorder %s18_s15, %s679_s6  ;;  %p685_p13 = scmp.lt.s32.totalorder %s679_s6, %s679_s6 }
  0x1c   :  { %p686_p0 = por %p685_p13, %p684_p12 }
  0x1e   :  { %p687_p1 = pnand %p686_p0, %p680_p11 }
  0x20   :  { %690 = shalt.err (!%p687_p1)
}
  0x21   :  { %20 = dma.hbm_to_vmem [thread:$0]  %s848_s0, 64, %s18_s15, [#allocation3]  }
  0x22   :  { %s743_s8 = smov [#allocation7]   ;;  %s691_s12 = scalar_lea.hbm %s850_s2, 5760 }
  0x23   :  { %s36_s9 = sshll.u32 %s743_s8, 4  ;;  %p692_p2 = scmp.ne.s32.totalorder %s850_s2, %s691_s12  ;;  %s37_s9 = int_to_ptr.vmem [resolvable:$true] %s36_s9 }
  0x24   :  { %p695_p3 = scmp.lt.u32.totalorder %s691_s12, %s850_s2 }
  0x26   :  { %p697_p4 = pnand %p695_p3, %p692_p2 }
  0x28   :  { %700 = shalt.err (!%p697_p4)
}
  0x29   :  { %s701_s18 = scalar_lea.vmem %s37_s9, 5760  ;;  %p706_p6 = scmp.lt.s32.totalorder %s37_s9, %s37_s9 }
  0x2a   :  { %p702_p5 = scmp.ne.s32.totalorder %s37_s9, %s701_s18  ;;  %p707_p7 = scmp.lt.s32.totalorder %s701_s18, %s701_s18 }
  0x2c   :  { %p708_p8 = por %p707_p7, %p706_p6 }
  0x2e   :  { %p709_p9 = pnand %p708_p8, %p702_p5 }
  0x30   :  { %712 = shalt.err (!%p709_p9)
}
  0x31   :  { %s744_s0 = smov 128   ;;  %s745_s15 = smov 8  }
  0x32   :  { %42 = dma.hbm_to_vmem [thread:$0]  %s850_s2, 5760, %s37_s9, [#allocation6], %s744_s0, %s744_s0, %s745_s15  }
  0x33   :  { %735 = dma.done.wait [#allocation3], 64  }
  0x34   :  { %736 = vsyncadd [#allocation3], 4294967232 }
  0x35   :  { %737 = dma.done.wait [#allocation6], 5824  }
  0x36   :  { %738 = vsyncadd [#allocation6], 4294961472  ;;  %v746_v0 = vmov 0.0|0.0   ;;  %vm747_vm0 = vmmov 0   ;;  %v748_v1 = vmov 0.0   ;;  %v56_v2 = vld [vmem:[#allocation7] sm:$0xff] }
  0x37   :  { %572 = vmatprep.subr.bf16.mxu0 %v746_v0  ;;  %480 = vmatprep.mubr.msk.f32.mxu0 %vm747_vm0, %v748_v1  ;;  %v57_v3 = vld [vmem:[#allocation7 + $0x8] sm:$0xff]  ;;  %v58_v4 = vld [vmem:[#allocation7 + $0x10] sm:$0xff]  ;;  %v59_v6 = vld [vmem:[#allocation7 + $0x18] sm:$0xff]  ;;  %vm105_vm1 = vcmask 261120   ;;  %vm180_vm2 = vcmask 523264   ;;  %s749_s2 = smov [#allocation8]  }
  0x38   :  { %578 = vmatprep.subr.bf16.mxu1 %v746_v0  ;;  %499 = vmatprep.mubr.msk.f32.mxu1 %vm747_vm0, %v748_v1  ;;  %v573_v5 = vpack.c.bf16 %v57_v3, %v56_v2  ;;  %v576_v7 = vpack.c.bf16 %v59_v6, %v58_v4  ;;  %v52_v8 = vld [vmem:[#allocation2] sm:$0xf]  ;;  %v60_v9 = vld [vmem:[#allocation7 + $0x20] sm:$0xff]  ;;  %v61_v10 = vld [vmem:[#allocation7 + $0x28] sm:$0xff]  ;;  %v101_v3 = vlaneseq  ;;  %s412_s21 = sshll.u32 %s749_s2, 4  ;;  %vm404_vm3 = vcmask 64512   ;;  %s413_s21 = int_to_ptr.vmem [resolvable:$true] %s412_s21 }
  0x39   :  { %v76_v11 = vld [vmem:[#allocation7 + $0xa0] sm:$0xff]  ;;  %v77_v12 = vld [vmem:[#allocation7 + $0xa8] sm:$0xff]  ;;  %v78_v14 = vld [vmem:[#allocation7 + $0xb0] sm:$0xff]  ;;  %v53_v15 = vunpack.c.l.bf16 %v52_v8  ;;  %v591_v17 = vpack.c.bf16 %v61_v10, %v60_v9  ;;  %s713_s22 = scalar_lea.vmem %s413_s21, 128  ;;  %p718_p11 = scmp.lt.s32.totalorder %s413_s21, %s413_s21 }
  0x3a   :  { %574 = vmatpush3.bf16.msra.mxu0 %v573_v5  ;;  %v579_v13 = vpack.c.bf16 %v77_v12, %v76_v11  ;;  %v79_v16 = vld [vmem:[#allocation7 + $0xb8] sm:$0xff]  ;;  %v62_v18 = vld [vmem:[#allocation7 + $0x30] sm:$0xff]  ;;  %v80_v21 = vld [vmem:[#allocation7 + $0xc0] sm:$0xff]  ;;  %v102_v4 = vshrl.u32 %v101_v3, 7  ;;  %p714_p10 = scmp.ne.s32.totalorder %s413_s21, %s713_s22  ;;  %p719_p12 = scmp.lt.s32.totalorder %s713_s22, %s713_s22 }
  0x3b   :  { %575 = vmatprep.subr.bf16.mxu0 %v746_v0  ;;  %v582_v19 = vpack.c.bf16 %v79_v16, %v78_v14  ;;  %v63_v20 = vld [vmem:[#allocation7 + $0x38] sm:$0xff]  ;;  %v81_v22 = vld [vmem:[#allocation7 + $0xc8] sm:$0xff]  ;;  %v64_v25 = vld [vmem:[#allocation7 + $0x40] sm:$0xff] }
  0x3c   :  { %580 = vmatpush3.bf16.msra.mxu1 %v579_v13  ;;  %v594_v23 = vpack.c.bf16 %v63_v20, %v62_v18  ;;  %v585_v24 = vpack.c.bf16 %v81_v22, %v80_v21  ;;  %v65_v26 = vld [vmem:[#allocation7 + $0x48] sm:$0xff]  ;;  %v66_v28 = vld [vmem:[#allocation7 + $0x50] sm:$0xff]  ;;  %v67_v29 = vld [vmem:[#allocation7 + $0x58] sm:$0xff]  ;;  %v103_v5 = vsub.s32 0, %v102_v4  ;;  %v326_v20 = vsub.s32 1, %v102_v4  ;;  %p720_p13 = por %p719_p12, %p718_p11 }
  0x3d   :  { %581 = vmatprep.subr.bf16.mxu1 %v746_v0  ;;  %v597_v27 = vpack.c.bf16 %v65_v26, %v64_v25  ;;  %v600_v30 = vpack.c.bf16 %v67_v29, %v66_v28  ;;  %v68_v31 = vld [vmem:[#allocation7 + $0x60] sm:$0xff]  ;;  %v69_v32 = vld [vmem:[#allocation7 + $0x68] sm:$0xff]  ;;  %v70_v34 = vld [vmem:[#allocation7 + $0x70] sm:$0xff] }
  0x3e   :  { %577 = vmatpush3.bf16.msra.mxu0 %v576_v7  ;;  %v603_v33 = vpack.c.bf16 %v69_v32, %v68_v31  ;;  %v71_v35 = vld [vmem:[#allocation7 + $0x78] sm:$0xff]  ;;  %v72_v37 = vld [vmem:[#allocation7 + $0x80] sm:$0xff]  ;;  %v73_v38 = vld [vmem:[#allocation7 + $0x88] sm:$0xff]  ;;  %p721_p0 = pnand %p720_p13, %p714_p10 }
  0x3f   :  { %590 = vmatprep.subr.bf16.mxu0 %v746_v0  ;;  %v606_v36 = vpack.c.bf16 %v71_v35, %v70_v34  ;;  %v609_v39 = vpack.c.bf16 %v73_v38, %v72_v37  ;;  %v82_v40 = vld [vmem:[#allocation7 + $0xd0] sm:$0xff]  ;;  %v83_v41 = vld [vmem:[#allocation7 + $0xd8] sm:$0xff]  ;;  %v84_v48 = vld [vmem:[#allocation7 + $0xe0] sm:$0xff] }
  0x40   :  { %583 = vmatpush3.bf16.msra.mxu1 %v582_v19  ;;  %v588_v42 = vpack.c.bf16 %v83_v41, %v82_v40  ;;  %v74_v43 = vld [vmem:[#allocation7 + $0x90] sm:$0xff]  ;;  %v75_v44 = vld [vmem:[#allocation7 + $0x98] sm:$0xff]  ;;  %v85_v49 = vld [vmem:[#allocation7 + $0xe8] sm:$0xff] }
  0x41   :  { %481 = vmatmul.mubr.msk.f32.vlgmr.msra.gmra.mrb[0].mxu0 %vm105_vm1, %v53_v15  ;;  %584 = vmatprep.subr.bf16.mxu1 %v746_v0  ;;  %v612_v45 = vpack.c.bf16 %v75_v44, %v74_v43  ;;  %v54_v46 = vld [vmem:[#allocation5] sm:$0xf]  ;;  %v86_v50 = vld [vmem:[#allocation7 + $0xf0] sm:$0xff]  ;;  %v615_v51 = vpack.c.bf16 %v85_v49, %v84_v48  ;;  %v88_v54 = vld [vmem:[#allocation7 + $0x100] sm:$0xff] }
  0x42   :  { %592 = vmatpush3.bf16.msra.mxu0 %v591_v17  ;;  %534 = vmatprep.mubr.msk.f32.mxu0 %vm747_vm0, %v748_v1  ;;  %v55_v47 = vunpack.c.l.bf16 %v54_v46  ;;  %v87_v52 = vld [vmem:[#allocation7 + $0xf8] sm:$0xff]  ;;  %v89_v55 = vld [vmem:[#allocation7 + $0x108] sm:$0xff]  ;;  %v90_v57 = vld [vmem:[#allocation7 + $0x110] sm:$0xff] }
  0x43   :  { %593 = vmatprep.subr.bf16.mxu0 %v746_v0  ;;  %v618_v53 = vpack.c.bf16 %v87_v52, %v86_v50  ;;  %v621_v56 = vpack.c.bf16 %v89_v55, %v88_v54  ;;  %v91_v58 = vld [vmem:[#allocation7 + $0x118] sm:$0xff]  ;;  %v92_v60 = vld [vmem:[#allocation7 + $0x120] sm:$0xff]  ;;  %v93_v61 = vld [vmem:[#allocation7 + $0x128] sm:$0xff] }
  0x44   :  { %586 = vmatpush3.bf16.msra.mxu1 %v585_v24  ;;  %v624_v59 = vpack.c.bf16 %v91_v58, %v90_v57  ;;  %v627_v62 = vpack.c.bf16 %v93_v61, %v92_v60  ;;  %v94_v63 = vld [vmem:[#allocation7 + $0x130] sm:$0xff]  ;;  %v100_v6 = vld [vmem:[#allocation7 + $0x160] sm:$0xff]  ;;  %v97_v13 = vld [vmem:[#allocation7 + $0x148] sm:$0xff] }
  0x45   :  { %587 = vmatprep.subr.bf16.mxu1 %v746_v0  ;;  %v104_v7 = vrot.slane %v100_v6, %v103_v5  ;;  %v96_v12 = vld [vmem:[#allocation7 + $0x140] sm:$0xff]  ;;  %v98_v17 = vld [vmem:[#allocation7 + $0x150] sm:$0xff]  ;;  %v99_v18 = vld [vmem:[#allocation7 + $0x158] sm:$0xff]  ;;  %v327_v21 = vrot.slane %v100_v6, %v326_v20 }
  0x46   :  { %595 = vmatpush3.bf16.msra.mxu0 %v594_v23  ;;  %v633_v14 = vpack.c.bf16 %v97_v13, %v96_v12  ;;  %v636_v19 = vpack.c.bf16 %v99_v18, %v98_v17 }
  0x47   :  { %596 = vmatprep.subr.bf16.mxu0 %v746_v0 }
  0x48   :  { %589 = vmatpush3.bf16.msra.mxu1 %v588_v42 }
  0x49   :  { %614 = vmatprep.subr.bf16.mxu1 %v746_v0 }
  0x4a   :  { %598 = vmatpush3.bf16.msra.mxu0 %v597_v27  ;;  %v332_v27 = vsub.s32 2, %v102_v4 }
  0x4b   :  { %599 = vmatprep.subr.bf16.mxu0 %v746_v0  ;;  %500 = vmatmul.mubr.msk.f32.vlgmr.msra.gmra.mrb[0].mxu1 %vm180_vm2, %v55_v47 }
  0x4c   :  { %569 = vmatprep.mubr.msk.f32.mxu1 %vm747_vm0, %v748_v1  ;;  %616 = vmatpush3.bf16.msra.mxu1 %v615_v51  ;;  %v95_v1 = vld [vmem:[#allocation7 + $0x138] sm:$0xff]  ;;  %v333_v28 = vrot.slane %v100_v6, %v332_v27 }
  0x4d   :  { %617 = vmatprep.subr.bf16.mxu1 %v746_v0  ;;  %v630_v2 = vpack.c.bf16 %v95_v1, %v94_v63 }
  0x4e   :  { %601 = vmatpush3.bf16.msra.mxu0 %v600_v30 }
  0x4f   :  { %602 = vmatprep.subr.bf16.mxu0 %v746_v0 }
  0x50   :  { %619 = vmatpush3.bf16.msra.mxu1 %v618_v53 }
  0x51   :  { %620 = vmatprep.subr.bf16.mxu1 %v746_v0 }
  0x52   :  { %604 = vmatpush3.bf16.msra.mxu0 %v603_v33 }
  0x53   :  { %605 = vmatprep.subr.bf16.mxu0 %v746_v0 }
  0x54   :  { %622 = vmatpush3.bf16.msra.mxu1 %v621_v56 }
  0x55   :  { %623 = vmatprep.subr.bf16.mxu1 %v746_v0 }
  0x56   :  { %607 = vmatpush3.bf16.msra.mxu0 %v606_v36 }
  0x57   :  { %608 = vmatprep.subr.bf16.mxu0 %v746_v0 }
  0x58   :  { %625 = vmatpush3.bf16.msra.mxu1 %v624_v59 }
  0x59   :  { %626 = vmatprep.subr.bf16.mxu1 %v746_v0 }
  0x5a   :  { %610 = vmatpush3.bf16.msra.mxu0 %v609_v39 }
  0x5b   :  { %611 = vmatprep.subr.bf16.mxu0 %v746_v0 }
  0x5c   :  { %628 = vmatpush3.bf16.msra.mxu1 %v627_v62 }
  0x5d   :  { %629 = vmatprep.subr.bf16.mxu1 %v746_v0 }
  0x5e   :  { %613 = vmatpush3.bf16.msra.mxu0 %v612_v45 }
  0x60   :  { %631 = vmatpush3.bf16.msra.mxu1 %v630_v2 }
  0x61   :  { %632 = vmatprep.subr.bf16.mxu1 %v746_v0 }
  0x64   :  { %634 = vmatpush3.bf16.msra.mxu1 %v633_v14 }
  0x65   :  { %635 = vmatprep.subr.bf16.mxu1 %v746_v0 }
  0x68   :  { %637 = vmatpush3.bf16.msra.mxu1 %v636_v19 }
 0x114   :  { %v175_v8 = vpop.f32.mrb[0].mxu0 }
 0x115   :  { %v176_v9 = vadd.f32 %v175_v8, %v104_v7  ;;  %v482_v10 = vpop.f32.mrb[1].mxu0 }
 0x117   :  { %v179_v11 = vmax.f32 %v176_v9, 0.0 }
 0x119   :  { %535 = vmatmul.mubr.f32.vlgmr.msra.gmra.mrb[2].mxu0 %v179_v11 }
 0x11e   :  { %v250_v15 = vpop.f32.mrb[0].mxu1 }
 0x11f   :  { %v501_v16 = vpop.f32.mrb[1].mxu1 }
 0x1ec   :  { %v320_v22 = vpop.f32.mrb[2].mxu0 }
 0x1ed   :  { %v321_v23 = vadd.f32 %v320_v22, %v250_v15  ;;  %v536_v24 = vpop.f32.mrb[3].mxu0 }
 0x1ef   :  { %v328_v25 = vadd.f32 %v327_v21, %v321_v23 }
 0x1f1   :  { %v329_v26 = vmax.f32 %v328_v25, 0.0 }
 0x1f3   :  { %570 = vmatmul.mubr.f32.vlgmr.msra.gmra.mrb[2].mxu1 %v329_v26 }
 0x2c6   :  { %v400_v29 = vpop.f32.mrb[2].mxu1 }
 0x2c7   :  { %v401_v30 = vadd.f32 %v400_v29, %v333_v28  ;;  %v571_v0 = vpop.f32.mrb[3].mxu1 }
 0x2c9   :  { %405 = vst.msk [vmem:[#allocation8] sm:$0xff] %vm404_vm3, %v401_v30 }
 0x2ca   :  { %724 = shalt.err (!%p721_p0)
}
 0x2cb   :  { %s725_s25 = scalar_lea.hbm %s851_s3, 128 }
 0x2cc   :  { %p726_p1 = scmp.ne.s32.totalorder %s851_s3, %s725_s25  ;;  %p729_p2 = scmp.lt.u32.totalorder %s725_s25, %s851_s3 }
 0x2ce   :  { %p731_p3 = pnand %p729_p2, %p726_p1 }
 0x2d0   :  { %734 = shalt.err (!%p731_p3)
}
 0x2d1   :  { %415 = dma.vmem_to_hbm [thread:$0]  %s413_s21, 128, %s851_s3, [#allocation4]  }
 0x2d2   :  { %739 = dma.done.wait [#allocation4], 128  }
 0x2d3   :  { %740 = vsyncadd [#allocation4], 4294967168 }
 0x2d4   :  { %419 = vsyncpa [#allocation3], 1 }
 0x2d5   :  { %420 = vsyncpa [#allocation6], 1 }
 0x2d6   :  { %421 = vsyncpa [#allocation4], 1 }

</bundles_post_ra>
